<compile_context>
chip_gen: v6e
topology: v6e:2x2x1
jax: 0.10.0
libtpu: 0.0.40
codegen_flags: <defaults>
</compile_context>

<pallas_src>
import math

import jax
import jax.numpy as jnp
import numpy as np
from jax.experimental import pallas as pl
from jax.experimental.pallas import tpu as pltpu

D_MODEL = 32
N_HEADS = 4
D_HEAD = D_MODEL // N_HEADS
D_FF = 64
N_LATENT = 16
VOCAB = 128          # lane-dense logits & one-hot embedding: last dim fills a 128-lane vreg
PAD_ID = 0
LN_EPS = 1e-6
NEG_INF = -1e9
FUSED_COLS = 256     # [W_vo (128) | W_q (32) | W_k (32) | zero pad (64)]

# rows of the packed (12, 128) bias / layer-norm parameter slab
R_B_LE, R_B_QK, R_B_O, R_B_1, R_B_2, R_B_PRJ = 0, 1, 2, 3, 4, 5
R_LN0_G, R_LN0_B, R_LN1_G, R_LN1_B, R_LN2_G, R_LN2_B = 6, 7, 8, 9, 10, 11


def _layer_norm(x, g, b):
    mu = jnp.mean(x, axis=-1, keepdims=True)
    var = jnp.mean(jnp.square(x - mu), axis=-1, keepdims=True)
    return (x - mu) * jax.lax.rsqrt(var + LN_EPS) * g + b


def decoder_kernel(seq_ref, pad_ref, lat_ref, pe_ref, emb_ref, pkd_ref,
                   w_le_ref, w_fused_ref, w_1_ref, w_2_ref, w_prj_ref, out_ref):
    S = seq_ref.shape[0]
    D = D_MODEL
    V = emb_ref.shape[0]
    HD = N_HEADS * D_MODEL

    # unpack the small-parameter slab with static slices (kept 2-D for clean layouts)
    pk = pkd_ref[...]                                                   # (12, 128)
    b_le  = pk[R_B_LE:R_B_LE + 1, :D]
    b_q   = pk[R_B_QK:R_B_QK + 1, :D]          # already pre-scaled by 1/sqrt(d_head)
    b_k   = pk[R_B_QK:R_B_QK + 1, D:2 * D]
    b_o   = pk[R_B_O:R_B_O + 1, :D]            # includes folded b_v @ W_o
    b_1   = pk[R_B_1:R_B_1 + 1, :D_FF]
    b_2   = pk[R_B_2:R_B_2 + 1, :D]
    b_prj = pk[R_B_PRJ:R_B_PRJ + 1, :V]
    ln0_g = pk[R_LN0_G:R_LN0_G + 1, :D]; ln0_b = pk[R_LN0_B:R_LN0_B + 1, :D]
    ln1_g = pk[R_LN1_G:R_LN1_G + 1, :D]; ln1_b = pk[R_LN1_B:R_LN1_B + 1, :D]
    ln2_g = pk[R_LN2_G:R_LN2_G + 1, :D]; ln2_b = pk[R_LN2_B:R_LN2_B + 1, :D]

    # word_emb fused as a one-hot matmul (K = 128, the only full-depth MXU pass).
    # emb table is pre-scaled by sqrt(d_model); pad row is zero (padding_idx).
    seq_col = seq_ref[...]                                              # (S, 1) int32
    vocab_iota = jax.lax.broadcasted_iota(jnp.int32, (S, V), 1)
    onehot = jnp.where(seq_col == vocab_iota, 1.0, 0.0)                 # (S, V) f32
    x = jnp.dot(onehot, emb_ref[...], preferred_element_type=jnp.float32)   # (S, D)

    # summary = latent_emb(latent) (pre-scaled by sqrt(d_model)); added only to row 0
    summary = jnp.dot(lat_ref[...], w_le_ref[...],
                      preferred_element_type=jnp.float32) + b_le        # (1, D)
    row = jax.lax.broadcasted_iota(jnp.int32, (S, 1), 0)
    x = x + jnp.where(row == 0, summary, 0.0) + pe_ref[...]

    # module-level layer_norm
    xn = _layer_norm(x, ln0_g, ln0_b)

    # fused projection: [W_vo | W_q' | W_k' | 0] -> (S, 256), two full 128-lane vregs
    fused = jnp.dot(xn, w_fused_ref[...], preferred_element_type=jnp.float32)
    vproj = fused[:, :HD]                                               # (S, 128) = x @ W_vo
    q = fused[:, HD:HD + D] + b_q                                       # (S, 32), pre-scaled
    k = fused[:, HD + D:HD + 2 * D] + b_k                               # (S, 32)

    # stack heads to (H, S, ·) so scores / PV / softmax are one batched op each
    q3 = jnp.stack([q[:, h * D_HEAD:(h + 1) * D_HEAD] for h in range(N_HEADS)], axis=0)
    k3 = jnp.stack([k[:, h * D_HEAD:(h + 1) * D_HEAD] for h in range(N_HEADS)], axis=0)
    v3 = jnp.stack([vproj[:, h * D:(h + 1) * D] for h in range(N_HEADS)], axis=0)  # (H, S, D)

    # causal additive bias from an (S,S) iota; pad bias arrives as a (1,S) additive row
    qi = jax.lax.broadcasted_iota(jnp.int32, (S, S), 0)
    ki = jax.lax.broadcasted_iota(jnp.int32, (S, S), 1)
    causal = jnp.where(qi >= ki, 0.0, NEG_INF)                          # (S, S)

    s = jnp.einsum('hqd,hkd->hqk', q3, k3, preferred_element_type=jnp.float32)
    s = s + causal[None] + pad_ref[...][None]                           # (H, S, S)
    s = s - jnp.max(s, axis=-1, keepdims=True)
    p = jnp.exp(s)
    p = p * pl.reciprocal(jnp.sum(p, axis=-1, keepdims=True), approx=True)

    # PV with W_o already folded in: (H,S,S) x (H,S,D) -> (H,S,D); sum heads -> (S,D)
    ctx = jnp.einsum('hqk,hkd->hqd', p, v3, preferred_element_type=jnp.float32)
    attn = jnp.sum(ctx, axis=0) + b_o                                   # (S, D)

    # residual + LN, feed-forward, residual + LN
    h1 = _layer_norm(xn + attn, ln1_g, ln1_b)
    ff = jnp.maximum(
        jnp.dot(h1, w_1_ref[...], preferred_element_type=jnp.float32) + b_1, 0.0)
    ff = jnp.dot(ff, w_2_ref[...], preferred_element_type=jnp.float32) + b_2
    h2 = _layer_norm(h1 + ff, ln2_g, ln2_b)

    # word_prj: (S, D) x (D, 128) -> lane-dense logits
    out_ref[...] = jnp.dot(h2, w_prj_ref[...],
                           preferred_element_type=jnp.float32) + b_prj


def run_decoder(seq_bs1, pad_bias, latent_b1n, pe, emb, packed,
                w_le, w_fused, w_1, w_2, w_prj):
    B, S, _ = seq_bs1.shape
    V = w_prj.shape[1]

    def const_spec(arr):
        return pl.BlockSpec(arr.shape, lambda b: (0,) * arr.ndim)

    args = (seq_bs1, pad_bias, latent_b1n, pe, emb, packed, w_le, w_fused, w_1, w_2, w_prj)
    flops = B * (
        2 * S * VOCAB * D_MODEL                     # one-hot embedding
        + 2 * N_LATENT * D_MODEL                    # latent_emb
        + 2 * S * D_MODEL * FUSED_COLS              # fused qk + folded vo projection
        + 2 * N_HEADS * S * S * (D_HEAD + D_MODEL)  # scores + PV
        + 4 * S * D_MODEL * D_FF                    # FFN
        + 2 * S * D_MODEL * VOCAB)                  # word_prj
    transcendentals = B * (N_HEADS * S * S + N_HEADS * S + 3 * S)
    bytes_accessed = (sum(int(np.prod(a.shape)) * a.dtype.itemsize for a in args)
                      + B * S * V * 4)

    return pl.pallas_call(
        decoder_kernel,
        out_shape=jax.ShapeDtypeStruct((B, S, V), jnp.float32),
        grid=(B,),
        in_specs=[
            pl.BlockSpec((None, S, 1), lambda b: (b, 0, 0)),          # seq ids
            pl.BlockSpec((None, 1, S), lambda b: (b, 0, 0)),          # pad additive bias
            pl.BlockSpec((None, 1, N_LATENT), lambda b: (b, 0, 0)),   # latent
            const_spec(pe),
            const_spec(emb),
            const_spec(packed),
            const_spec(w_le),
            const_spec(w_fused),
            const_spec(w_1),
            const_spec(w_2),
            const_spec(w_prj),
        ],
        out_specs=pl.BlockSpec((None, S, V), lambda b: (b, 0, 0)),
        compiler_params=pltpu.CompilerParams(
            dimension_semantics=("parallel",),        # batch steps split across v7x's 2 TCs
            vmem_limit_bytes=32 * 1024 * 1024),       # per-step footprint is one sequence
        cost_estimate=pl.CostEstimate(flops=int(flops),
                                      transcendentals=int(transcendentals),
                                      bytes_accessed=int(bytes_accessed)),
    )(*args)


def sinusoid_table(n_position, d_model):
    pos = np.arange(n_position)[:, None].astype(np.float64)
    i = np.arange(d_model)[None, :].astype(np.float64)
    angle = pos / np.power(10000.0, 2 * (i // 2) / d_model)
    table = np.zeros((n_position, d_model), dtype=np.float32)
    table[:, 0::2] = np.sin(angle[:, 0::2])
    table[:, 1::2] = np.cos(angle[:, 1::2])
    return jnp.asarray(table)


def init_params(key):
    """Canonical (PyTorch-layout) parameters of the module."""
    ks = jax.random.split(key, 20)

    def nrm(k, shape):
        return jax.random.normal(k, shape, jnp.float32) * 0.02

    p = {}
    emb = nrm(ks[0], (VOCAB, D_MODEL))
    p["emb"] = emb.at[PAD_ID].set(0.0)                      # padding_idx=pad_id
    p["pe"] = sinusoid_table(256, D_MODEL)
    p["w_le"] = nrm(ks[1], (N_LATENT, D_MODEL)); p["b_le"] = nrm(ks[2], (D_MODEL,))
    p["w_q"] = nrm(ks[3], (D_MODEL, D_MODEL));   p["b_q"] = nrm(ks[4], (D_MODEL,))
    p["w_k"] = nrm(ks[5], (D_MODEL, D_MODEL));   p["b_k"] = nrm(ks[6], (D_MODEL,))
    p["w_v"] = nrm(ks[7], (D_MODEL, D_MODEL));   p["b_v"] = nrm(ks[8], (D_MODEL,))
    p["w_o"] = nrm(ks[9], (D_MODEL, D_MODEL));   p["b_o"] = nrm(ks[10], (D_MODEL,))
    p["w_1"] = nrm(ks[11], (D_MODEL, D_FF));     p["b_1"] = nrm(ks[12], (D_FF,))
    p["w_2"] = nrm(ks[13], (D_FF, D_MODEL));     p["b_2"] = nrm(ks[14], (D_MODEL,))
    p["w_prj"] = nrm(ks[15], (D_MODEL, VOCAB));  p["b_prj"] = nrm(ks[16], (VOCAB,))
    for nm in ("ln0", "ln1", "ln2"):
        p[nm + "_g"] = jnp.ones((D_MODEL,), jnp.float32)
        p[nm + "_b"] = jnp.zeros((D_MODEL,), jnp.float32)
    return p


def pack_params(p):
    """Fold / pre-scale / pack canonical params into the kernel layout (done once)."""
    inv_dh = 1.0 / math.sqrt(D_HEAD)     # fold attention temperature into W_q, b_q
    sq_d = math.sqrt(D_MODEL)            # fold x *= sqrt(d_model) into emb / latent_emb

    # per-head fold: W_vo_h = W_v[:, h] @ W_o[h, :]  -> stacked (D, H*D) = (32, 128)
    w_vo = jnp.concatenate(
        [p["w_v"][:, h * D_HEAD:(h + 1) * D_HEAD] @ p["w_o"][h * D_HEAD:(h + 1) * D_HEAD, :]
         for h in range(N_HEADS)], axis=1)
    b_o_fold = p["b_o"] + p["b_v"] @ p["w_o"]        # softmax rows sum to 1 -> exact fold

    w_fused = jnp.concatenate(
        [w_vo, p["w_q"] * inv_dh, p["w_k"],
         jnp.zeros((D_MODEL, FUSED_COLS - N_HEADS * D_MODEL - 2 * D_MODEL), jnp.float32)],
        axis=1)                                                          # (32, 256)

    def pad128(v):
        return jnp.pad(v, (0, 128 - v.shape[0]))

    rows = [None] * 12
    rows[R_B_LE]  = pad128(p["b_le"] * sq_d)
    rows[R_B_QK]  = pad128(jnp.concatenate([p["b_q"] * inv_dh, p["b_k"]]))
    rows[R_B_O]   = pad128(b_o_fold)
    rows[R_B_1]   = pad128(p["b_1"])
    rows[R_B_2]   = pad128(p["b_2"])
    rows[R_B_PRJ] = pad128(p["b_prj"])
    rows[R_LN0_G] = pad128(p["ln0_g"]); rows[R_LN0_B] = pad128(p["ln0_b"])
    rows[R_LN1_G] = pad128(p["ln1_g"]); rows[R_LN1_B] = pad128(p["ln1_b"])
    rows[R_LN2_G] = pad128(p["ln2_g"]); rows[R_LN2_B] = pad128(p["ln2_b"])

    return {
        "emb": p["emb"] * sq_d,
        "pe": p["pe"],
        "packed": jnp.stack(rows),               # (12, 128)
        "w_le": p["w_le"] * sq_d,
        "w_fused": w_fused,
        "w_1": p["w_1"], "w_2": p["w_2"], "w_prj": p["w_prj"],
    }


def seq_share_decoder_forward(seq, latent, kp):
    B, S = seq.shape
    seq_i = seq.astype(jnp.int32)
    # O(S) pad additive bias ((pad-1)*1e9 style); causal bias is built in-kernel from iota.
    pad_bias = jnp.where(seq_i == PAD_ID, NEG_INF, 0.0).astype(jnp.float32)[:, None, :]
    return run_decoder(seq_i[:, :, None],                  # (B, S, 1) token ids
                       pad_bias,                           # (B, 1, S)
                       latent[:, None, :].astype(jnp.float32),   # (B, 1, n_latent)
                       kp["pe"][:S], kp["emb"], kp["packed"], kp["w_le"],
                       kp["w_fused"], kp["w_1"], kp["w_2"], kp["w_prj"])


if __name__ == "__main__":
    key = jax.random.PRNGKey(0)
    params = init_params(key)
    kparams = pack_params(params)

    # batch=2, seq=8; trailing PAD_ID tokens exercise the pad mask.
    seq = jnp.array(
        [[5, 7, 2, 9, 3, PAD_ID, PAD_ID, PAD_ID],
         [4, 6, 8, 11, 12, 13, PAD_ID, PAD_ID]],
        dtype=jnp.int32)
    latent = jax.random.normal(jax.random.fold_in(key, 1), (2, N_LATENT), jnp.float32)

    logits = seq_share_decoder_forward(seq, latent, kparams)
    jax.block_until_ready(logits)
    assert logits.shape == (2, 8, VOCAB)
    assert bool(jnp.all(jnp.isfinite(logits)))
    print("KERNEL_OK")
</pallas_src>

<mosaic_0001>
module attributes {stable_mosaic.version = 11 : i64} {
  func.func @decoder_kernel(%arg0: i32, %arg1: memref<1x8x1xi32, #tpu.memory_space<vmem>>, %arg2: memref<1x1x8xf32, #tpu.memory_space<vmem>>, %arg3: memref<1x1x16xf32, #tpu.memory_space<vmem>>, %arg4: memref<8x32xf32, #tpu.memory_space<vmem>>, %arg5: memref<128x32xf32, #tpu.memory_space<vmem>>, %arg6: memref<12x128xf32, #tpu.memory_space<vmem>>, %arg7: memref<16x32xf32, #tpu.memory_space<vmem>>, %arg8: memref<32x256xf32, #tpu.memory_space<vmem>>, %arg9: memref<32x64xf32, #tpu.memory_space<vmem>>, %arg10: memref<64x32xf32, #tpu.memory_space<vmem>>, %arg11: memref<32x128xf32, #tpu.memory_space<vmem>>, %arg12: memref<1x8x128xf32, #tpu.memory_space<vmem>>) attributes {dimension_semantics = [#tpu.dimension_semantics<parallel>], iteration_bounds = array<i64: 2>, scalar_prefetch = 0 : i64, scratch_operands = 0 : i64, tpu.core_type = #tpu.core_type<tc>, window_params = [{transform_indices = @transform_0, window_bounds = array<i64: 1, 8, 1>}, {transform_indices = @transform_1, window_bounds = array<i64: 1, 1, 8>}, {transform_indices = @transform_2, window_bounds = array<i64: 1, 1, 16>}, {pipeline_mode = #tpu.pipeline_mode<synchronous>, transform_indices = @transform_3, window_bounds = array<i64: 8, 32>}, {pipeline_mode = #tpu.pipeline_mode<synchronous>, transform_indices = @transform_4, window_bounds = array<i64: 128, 32>}, {pipeline_mode = #tpu.pipeline_mode<synchronous>, transform_indices = @transform_5, window_bounds = array<i64: 12, 128>}, {pipeline_mode = #tpu.pipeline_mode<synchronous>, transform_indices = @transform_6, window_bounds = array<i64: 16, 32>}, {pipeline_mode = #tpu.pipeline_mode<synchronous>, transform_indices = @transform_7, window_bounds = array<i64: 32, 256>}, {pipeline_mode = #tpu.pipeline_mode<synchronous>, transform_indices = @transform_8, window_bounds = array<i64: 32, 64>}, {pipeline_mode = #tpu.pipeline_mode<synchronous>, transform_indices = @transform_9, window_bounds = array<i64: 64, 32>}, {pipeline_mode = #tpu.pipeline_mode<synchronous>, transform_indices = @transform_10, window_bounds = array<i64: 32, 128>}, {transform_indices = @transform_11, window_bounds = array<i64: 1, 8, 128>}]} {
    %c0 = arith.constant 0 : index
    %c0_0 = arith.constant 0 : index
    %0 = vector.load %arg6[%c0, %c0_0] : memref<12x128xf32, #tpu.memory_space<vmem>>, vector<12x128xf32>
    %1 = vector.extract_strided_slice %0 {offsets = [0, 0], sizes = [1, 32], strides = [1, 1]} : vector<12x128xf32> to vector<1x32xf32>
    %2 = vector.extract_strided_slice %0 {offsets = [1, 0], sizes = [1, 32], strides = [1, 1]} : vector<12x128xf32> to vector<1x32xf32>
    %3 = vector.extract_strided_slice %0 {offsets = [1, 32], sizes = [1, 32], strides = [1, 1]} : vector<12x128xf32> to vector<1x32xf32>
    %4 = vector.extract_strided_slice %0 {offsets = [2, 0], sizes = [1, 32], strides = [1, 1]} : vector<12x128xf32> to vector<1x32xf32>
    %5 = vector.extract_strided_slice %0 {offsets = [3, 0], sizes = [1, 64], strides = [1, 1]} : vector<12x128xf32> to vector<1x64xf32>
    %6 = vector.extract_strided_slice %0 {offsets = [4, 0], sizes = [1, 32], strides = [1, 1]} : vector<12x128xf32> to vector<1x32xf32>
    %7 = vector.extract_strided_slice %0 {offsets = [5, 0], sizes = [1, 128], strides = [1, 1]} : vector<12x128xf32> to vector<1x128xf32>
    %8 = vector.extract_strided_slice %0 {offsets = [6, 0], sizes = [1, 32], strides = [1, 1]} : vector<12x128xf32> to vector<1x32xf32>
    %9 = vector.extract_strided_slice %0 {offsets = [7, 0], sizes = [1, 32], strides = [1, 1]} : vector<12x128xf32> to vector<1x32xf32>
    %10 = vector.extract_strided_slice %0 {offsets = [8, 0], sizes = [1, 32], strides = [1, 1]} : vector<12x128xf32> to vector<1x32xf32>
    %11 = vector.extract_strided_slice %0 {offsets = [9, 0], sizes = [1, 32], strides = [1, 1]} : vector<12x128xf32> to vector<1x32xf32>
    %12 = vector.extract_strided_slice %0 {offsets = [10, 0], sizes = [1, 32], strides = [1, 1]} : vector<12x128xf32> to vector<1x32xf32>
    %13 = vector.extract_strided_slice %0 {offsets = [11, 0], sizes = [1, 32], strides = [1, 1]} : vector<12x128xf32> to vector<1x32xf32>
    %c0_1 = arith.constant 0 : index
    %c0_2 = arith.constant 0 : index
    %c0_3 = arith.constant 0 : index
    %14 = vector.load %arg1[%c0_1, %c0_2, %c0_3] : memref<1x8x1xi32, #tpu.memory_space<vmem>>, vector<1x8x1xi32>
    %15 = vector.shape_cast %14 : vector<1x8x1xi32> to vector<8x1xi32>
    %16 = tpu.iota {dimensions = array<i32: 1>} : vector<8x128xi32>
    %17 = vector.broadcast %15 : vector<8x1xi32> to vector<8x128xi32>
    %18 = arith.cmpi eq, %17, %16 : vector<8x128xi32>
    %cst = arith.constant 1.000000e+00 : f32
    %cst_4 = arith.constant 0.000000e+00 : f32
    %19 = vector.broadcast %cst : f32 to vector<8x128xf32>
    %20 = vector.broadcast %cst_4 : f32 to vector<8x128xf32>
    %21 = arith.select %18, %19, %20 : vector<8x128xi1>, vector<8x128xf32>
    %c0_5 = arith.constant 0 : index
    %c0_6 = arith.constant 0 : index
    %22 = vector.load %arg5[%c0_5, %c0_6] : memref<128x32xf32, #tpu.memory_space<vmem>>, vector<128x32xf32>
    %cst_7 = arith.constant dense<0.000000e+00> : vector<8x32xf32>
    %23 = tpu.matmul %21, %22, %cst_7 {dimension_numbers = #tpu.dot_dimension_numbers<[1], [0], [0], [1], [0, 0, 1, 1], [], []>} : vector<8x128xf32>, vector<128x32xf32>, vector<8x32xf32> -> vector<8x32xf32>
    %c0_8 = arith.constant 0 : index
    %c0_9 = arith.constant 0 : index
    %c0_10 = arith.constant 0 : index
    %24 = vector.load %arg3[%c0_8, %c0_9, %c0_10] : memref<1x1x16xf32, #tpu.memory_space<vmem>>, vector<1x1x16xf32>
    %25 = vector.shape_cast %24 : vector<1x1x16xf32> to vector<1x16xf32>
    %c0_11 = arith.constant 0 : index
    %c0_12 = arith.constant 0 : index
    %26 = vector.load %arg7[%c0_11, %c0_12] : memref<16x32xf32, #tpu.memory_space<vmem>>, vector<16x32xf32>
    %cst_13 = arith.constant dense<0.000000e+00> : vector<1x32xf32>
    %27 = tpu.matmul %25, %26, %cst_13 {dimension_numbers = #tpu.dot_dimension_numbers<[1], [0], [0], [1], [0, 0, 1, 1], [], []>} : vector<1x16xf32>, vector<16x32xf32>, vector<1x32xf32> -> vector<1x32xf32>
    %28 = arith.addf %27, %1 : vector<1x32xf32>
    %29 = tpu.iota {dimensions = array<i32: 0>} : vector<8x1xi32>
    %c0_i32 = arith.constant 0 : i32
    %30 = vector.broadcast %c0_i32 : i32 to vector<8x1xi32>
    %31 = arith.cmpi eq, %29, %30 : vector<8x1xi32>
    %cst_14 = arith.constant 0.000000e+00 : f32
    %32 = vector.shape_cast %31 : vector<8x1xi1> to vector<8x1xi1>
    %33 = vector.broadcast %32 : vector<8x1xi1> to vector<8x32xi1>
    %34 = vector.shape_cast %28 : vector<1x32xf32> to vector<1x32xf32>
    %35 = vector.broadcast %34 : vector<1x32xf32> to vector<8x32xf32>
    %36 = vector.broadcast %cst_14 : f32 to vector<8x32xf32>
    %37 = arith.select %33, %35, %36 : vector<8x32xi1>, vector<8x32xf32>
    %38 = arith.addf %23, %37 : vector<8x32xf32>
    %c0_15 = arith.constant 0 : index
    %c0_16 = arith.constant 0 : index
    %39 = vector.load %arg4[%c0_15, %c0_16] : memref<8x32xf32, #tpu.memory_space<vmem>>, vector<8x32xf32>
    %40 = arith.addf %38, %39 : vector<8x32xf32>
    %cst_17 = arith.constant dense<0.000000e+00> : vector<8xf32>
    %41 = vector.multi_reduction <add>, %40, %cst_17 [1] : vector<8x32xf32> to vector<8xf32>
    %42 = vector.shape_cast %41 : vector<8xf32> to vector<8x1xf32>
    %cst_18 = arith.constant 3.200000e+01 : f32
    %43 = vector.broadcast %cst_18 : f32 to vector<8x1xf32>
    %44 = arith.divf %42, %43 : vector<8x1xf32>
    %45 = vector.broadcast %44 : vector<8x1xf32> to vector<8x32xf32>
    %46 = arith.subf %40, %45 : vector<8x32xf32>
    %47 = arith.mulf %46, %46 : vector<8x32xf32>
    %cst_19 = arith.constant dense<0.000000e+00> : vector<8xf32>
    %48 = vector.multi_reduction <add>, %47, %cst_19 [1] : vector<8x32xf32> to vector<8xf32>
    %49 = vector.shape_cast %48 : vector<8xf32> to vector<8x1xf32>
    %cst_20 = arith.constant 3.200000e+01 : f32
    %50 = vector.broadcast %cst_20 : f32 to vector<8x1xf32>
    %51 = arith.divf %49, %50 : vector<8x1xf32>
    %52 = vector.broadcast %44 : vector<8x1xf32> to vector<8x32xf32>
    %53 = arith.subf %40, %52 : vector<8x32xf32>
    %cst_21 = arith.constant 9.99999997E-7 : f32
    %54 = vector.broadcast %cst_21 : f32 to vector<8x1xf32>
    %55 = arith.addf %51, %54 : vector<8x1xf32>
    %56 = math.rsqrt %55 : vector<8x1xf32>
    %57 = vector.broadcast %56 : vector<8x1xf32> to vector<8x32xf32>
    %58 = arith.mulf %53, %57 : vector<8x32xf32>
    %59 = vector.broadcast %8 : vector<1x32xf32> to vector<8x32xf32>
    %60 = arith.mulf %58, %59 : vector<8x32xf32>
    %61 = vector.broadcast %9 : vector<1x32xf32> to vector<8x32xf32>
    %62 = arith.addf %60, %61 : vector<8x32xf32>
    %c0_22 = arith.constant 0 : index
    %c0_23 = arith.constant 0 : index
    %63 = vector.load %arg8[%c0_22, %c0_23] : memref<32x256xf32, #tpu.memory_space<vmem>>, vector<32x256xf32>
    %cst_24 = arith.constant dense<0.000000e+00> : vector<8x256xf32>
    %64 = tpu.matmul %62, %63, %cst_24 {dimension_numbers = #tpu.dot_dimension_numbers<[1], [0], [0], [1], [0, 0, 1, 1], [], []>} : vector<8x32xf32>, vector<32x256xf32>, vector<8x256xf32> -> vector<8x256xf32>
    %65 = vector.extract_strided_slice %64 {offsets = [0, 0], sizes = [8, 128], strides = [1, 1]} : vector<8x256xf32> to vector<8x128xf32>
    %66 = vector.extract_strided_slice %64 {offsets = [0, 128], sizes = [8, 32], strides = [1, 1]} : vector<8x256xf32> to vector<8x32xf32>
    %67 = vector.broadcast %2 : vector<1x32xf32> to vector<8x32xf32>
    %68 = arith.addf %66, %67 : vector<8x32xf32>
    %69 = vector.extract_strided_slice %64 {offsets = [0, 160], sizes = [8, 32], strides = [1, 1]} : vector<8x256xf32> to vector<8x32xf32>
    %70 = vector.broadcast %3 : vector<1x32xf32> to vector<8x32xf32>
    %71 = arith.addf %69, %70 : vector<8x32xf32>
    %72 = vector.extract_strided_slice %68 {offsets = [0, 0], sizes = [8, 8], strides = [1, 1]} : vector<8x32xf32> to vector<8x8xf32>
    %73 = vector.extract_strided_slice %68 {offsets = [0, 8], sizes = [8, 8], strides = [1, 1]} : vector<8x32xf32> to vector<8x8xf32>
    %74 = vector.extract_strided_slice %68 {offsets = [0, 16], sizes = [8, 8], strides = [1, 1]} : vector<8x32xf32> to vector<8x8xf32>
    %75 = vector.extract_strided_slice %68 {offsets = [0, 24], sizes = [8, 8], strides = [1, 1]} : vector<8x32xf32> to vector<8x8xf32>
    %76 = vector.shape_cast %72 : vector<8x8xf32> to vector<1x8x8xf32>
    %77 = vector.shape_cast %73 : vector<8x8xf32> to vector<1x8x8xf32>
    %78 = vector.shape_cast %74 : vector<8x8xf32> to vector<1x8x8xf32>
    %79 = vector.shape_cast %75 : vector<8x8xf32> to vector<1x8x8xf32>
    %80 = tpu.concatenate %76, %77, %78, %79 in 0 : vector<1x8x8xf32>, vector<1x8x8xf32>, vector<1x8x8xf32>, vector<1x8x8xf32> -> vector<4x8x8xf32>
    %81 = vector.extract_strided_slice %71 {offsets = [0, 0], sizes = [8, 8], strides = [1, 1]} : vector<8x32xf32> to vector<8x8xf32>
    %82 = vector.extract_strided_slice %71 {offsets = [0, 8], sizes = [8, 8], strides = [1, 1]} : vector<8x32xf32> to vector<8x8xf32>
    %83 = vector.extract_strided_slice %71 {offsets = [0, 16], sizes = [8, 8], strides = [1, 1]} : vector<8x32xf32> to vector<8x8xf32>
    %84 = vector.extract_strided_slice %71 {offsets = [0, 24], sizes = [8, 8], strides = [1, 1]} : vector<8x32xf32> to vector<8x8xf32>
    %85 = vector.shape_cast %81 : vector<8x8xf32> to vector<1x8x8xf32>
    %86 = vector.shape_cast %82 : vector<8x8xf32> to vector<1x8x8xf32>
    %87 = vector.shape_cast %83 : vector<8x8xf32> to vector<1x8x8xf32>
    %88 = vector.shape_cast %84 : vector<8x8xf32> to vector<1x8x8xf32>
    %89 = tpu.concatenate %85, %86, %87, %88 in 0 : vector<1x8x8xf32>, vector<1x8x8xf32>, vector<1x8x8xf32>, vector<1x8x8xf32> -> vector<4x8x8xf32>
    %90 = vector.extract_strided_slice %65 {offsets = [0, 0], sizes = [8, 32], strides = [1, 1]} : vector<8x128xf32> to vector<8x32xf32>
    %91 = vector.extract_strided_slice %65 {offsets = [0, 32], sizes = [8, 32], strides = [1, 1]} : vector<8x128xf32> to vector<8x32xf32>
    %92 = vector.extract_strided_slice %65 {offsets = [0, 64], sizes = [8, 32], strides = [1, 1]} : vector<8x128xf32> to vector<8x32xf32>
    %93 = vector.extract_strided_slice %65 {offsets = [0, 96], sizes = [8, 32], strides = [1, 1]} : vector<8x128xf32> to vector<8x32xf32>
    %94 = vector.shape_cast %90 : vector<8x32xf32> to vector<1x8x32xf32>
    %95 = vector.shape_cast %91 : vector<8x32xf32> to vector<1x8x32xf32>
    %96 = vector.shape_cast %92 : vector<8x32xf32> to vector<1x8x32xf32>
    %97 = vector.shape_cast %93 : vector<8x32xf32> to vector<1x8x32xf32>
    %98 = tpu.concatenate %94, %95, %96, %97 in 0 : vector<1x8x32xf32>, vector<1x8x32xf32>, vector<1x8x32xf32>, vector<1x8x32xf32> -> vector<4x8x32xf32>
    %99 = tpu.iota {dimensions = array<i32: 0>} : vector<8x8xi32>
    %100 = tpu.iota {dimensions = array<i32: 1>} : vector<8x8xi32>
    %101 = arith.cmpi sge, %99, %100 : vector<8x8xi32>
    %cst_25 = arith.constant 0.000000e+00 : f32
    %cst_26 = arith.constant -1.000000e+09 : f32
    %102 = vector.broadcast %cst_25 : f32 to vector<8x8xf32>
    %103 = vector.broadcast %cst_26 : f32 to vector<8x8xf32>
    %104 = arith.select %101, %102, %103 : vector<8x8xi1>, vector<8x8xf32>
    "tpu.trace_start"() <{level = 10 : i32, message = "hqd,hkd->hqk"}> : () -> ()
    %cst_27 = arith.constant dense<0.000000e+00> : vector<4x8x8xf32>
    %105 = tpu.matmul %80, %89, %cst_27 {dimension_numbers = #tpu.dot_dimension_numbers<[2], [2], [1], [1], [0, 0, 0, 1, 1, 1], [0], [0]>} : vector<4x8x8xf32>, vector<4x8x8xf32>, vector<4x8x8xf32> -> vector<4x8x8xf32>
    "tpu.trace_stop"() : () -> ()
    %106 = vector.shape_cast %104 : vector<8x8xf32> to vector<1x8x8xf32>
    %107 = vector.broadcast %106 : vector<1x8x8xf32> to vector<4x8x8xf32>
    %108 = arith.addf %105, %107 : vector<4x8x8xf32>
    %c0_28 = arith.constant 0 : index
    %c0_29 = arith.constant 0 : index
    %c0_30 = arith.constant 0 : index
    %109 = vector.load %arg2[%c0_28, %c0_29, %c0_30] : memref<1x1x8xf32, #tpu.memory_space<vmem>>, vector<1x1x8xf32>
    %110 = vector.shape_cast %109 : vector<1x1x8xf32> to vector<1x8xf32>
    %111 = vector.shape_cast %110 : vector<1x8xf32> to vector<1x1x8xf32>
    %112 = vector.broadcast %111 : vector<1x1x8xf32> to vector<4x8x8xf32>
    %113 = arith.addf %108, %112 : vector<4x8x8xf32>
    %cst_31 = arith.constant dense<0xFF800000> : vector<4x8xf32>
    %114 = vector.multi_reduction <maximumf>, %113, %cst_31 [2] : vector<4x8x8xf32> to vector<4x8xf32>
    %115 = vector.shape_cast %114 : vector<4x8xf32> to vector<4x8x1xf32>
    %116 = vector.broadcast %115 : vector<4x8x1xf32> to vector<4x8x8xf32>
    %117 = arith.subf %113, %116 : vector<4x8x8xf32>
    %118 = math.exp %117 : vector<4x8x8xf32>
    %cst_32 = arith.constant dense<0.000000e+00> : vector<4x8xf32>
    %119 = vector.multi_reduction <add>, %118, %cst_32 [2] : vector<4x8x8xf32> to vector<4x8xf32>
    %120 = vector.shape_cast %119 : vector<4x8xf32> to vector<4x8x1xf32>
    %121 = tpu.reciprocal %120 {approx = true} : vector<4x8x1xf32> -> vector<4x8x1xf32>
    %122 = vector.broadcast %121 : vector<4x8x1xf32> to vector<4x8x8xf32>
    %123 = arith.mulf %118, %122 : vector<4x8x8xf32>
    "tpu.trace_start"() <{level = 10 : i32, message = "hqk,hkd->hqd"}> : () -> ()
    %cst_33 = arith.constant dense<0.000000e+00> : vector<4x8x32xf32>
    %124 = tpu.matmul %123, %98, %cst_33 {dimension_numbers = #tpu.dot_dimension_numbers<[2], [1], [1], [2], [0, 0, 0, 1, 1, 2], [0], [0]>} : vector<4x8x8xf32>, vector<4x8x32xf32>, vector<4x8x32xf32> -> vector<4x8x32xf32>
    "tpu.trace_stop"() : () -> ()
    %cst_34 = arith.constant dense<0.000000e+00> : vector<8x32xf32>
    %125 = vector.multi_reduction <add>, %124, %cst_34 [0] : vector<4x8x32xf32> to vector<8x32xf32>
    %126 = vector.broadcast %4 : vector<1x32xf32> to vector<8x32xf32>
    %127 = arith.addf %125, %126 : vector<8x32xf32>
    %128 = arith.addf %62, %127 : vector<8x32xf32>
    %cst_35 = arith.constant dense<0.000000e+00> : vector<8xf32>
    %129 = vector.multi_reduction <add>, %128, %cst_35 [1] : vector<8x32xf32> to vector<8xf32>
    %130 = vector.shape_cast %129 : vector<8xf32> to vector<8x1xf32>
    %cst_36 = arith.constant 3.200000e+01 : f32
    %131 = vector.broadcast %cst_36 : f32 to vector<8x1xf32>
    %132 = arith.divf %130, %131 : vector<8x1xf32>
    %133 = vector.broadcast %132 : vector<8x1xf32> to vector<8x32xf32>
    %134 = arith.subf %128, %133 : vector<8x32xf32>
    %135 = arith.mulf %134, %134 : vector<8x32xf32>
    %cst_37 = arith.constant dense<0.000000e+00> : vector<8xf32>
    %136 = vector.multi_reduction <add>, %135, %cst_37 [1] : vector<8x32xf32> to vector<8xf32>
    %137 = vector.shape_cast %136 : vector<8xf32> to vector<8x1xf32>
    %cst_38 = arith.constant 3.200000e+01 : f32
    %138 = vector.broadcast %cst_38 : f32 to vector<8x1xf32>
    %139 = arith.divf %137, %138 : vector<8x1xf32>
    %140 = vector.broadcast %132 : vector<8x1xf32> to vector<8x32xf32>
    %141 = arith.subf %128, %140 : vector<8x32xf32>
    %cst_39 = arith.constant 9.99999997E-7 : f32
    %142 = vector.broadcast %cst_39 : f32 to vector<8x1xf32>
    %143 = arith.addf %139, %142 : vector<8x1xf32>
    %144 = math.rsqrt %143 : vector<8x1xf32>
    %145 = vector.broadcast %144 : vector<8x1xf32> to vector<8x32xf32>
    %146 = arith.mulf %141, %145 : vector<8x32xf32>
    %147 = vector.broadcast %10 : vector<1x32xf32> to vector<8x32xf32>
    %148 = arith.mulf %146, %147 : vector<8x32xf32>
    %149 = vector.broadcast %11 : vector<1x32xf32> to vector<8x32xf32>
    %150 = arith.addf %148, %149 : vector<8x32xf32>
    %c0_40 = arith.constant 0 : index
    %c0_41 = arith.constant 0 : index
    %151 = vector.load %arg9[%c0_40, %c0_41] : memref<32x64xf32, #tpu.memory_space<vmem>>, vector<32x64xf32>
    %cst_42 = arith.constant dense<0.000000e+00> : vector<8x64xf32>
    %152 = tpu.matmul %150, %151, %cst_42 {dimension_numbers = #tpu.dot_dimension_numbers<[1], [0], [0], [1], [0, 0, 1, 1], [], []>} : vector<8x32xf32>, vector<32x64xf32>, vector<8x64xf32> -> vector<8x64xf32>
    %153 = vector.broadcast %5 : vector<1x64xf32> to vector<8x64xf32>
    %154 = arith.addf %152, %153 : vector<8x64xf32>
    %cst_43 = arith.constant 0.000000e+00 : f32
    %155 = vector.broadcast %cst_43 : f32 to vector<8x64xf32>
    %156 = arith.maximumf %154, %155 : vector<8x64xf32>
    %c0_44 = arith.constant 0 : index
    %c0_45 = arith.constant 0 : index
    %157 = vector.load %arg10[%c0_44, %c0_45] : memref<64x32xf32, #tpu.memory_space<vmem>>, vector<64x32xf32>
    %cst_46 = arith.constant dense<0.000000e+00> : vector<8x32xf32>
    %158 = tpu.matmul %156, %157, %cst_46 {dimension_numbers = #tpu.dot_dimension_numbers<[1], [0], [0], [1], [0, 0, 1, 1], [], []>} : vector<8x64xf32>, vector<64x32xf32>, vector<8x32xf32> -> vector<8x32xf32>
    %159 = vector.broadcast %6 : vector<1x32xf32> to vector<8x32xf32>
    %160 = arith.addf %158, %159 : vector<8x32xf32>
    %161 = arith.addf %150, %160 : vector<8x32xf32>
    %cst_47 = arith.constant dense<0.000000e+00> : vector<8xf32>
    %162 = vector.multi_reduction <add>, %161, %cst_47 [1] : vector<8x32xf32> to vector<8xf32>
    %163 = vector.shape_cast %162 : vector<8xf32> to vector<8x1xf32>
    %cst_48 = arith.constant 3.200000e+01 : f32
    %164 = vector.broadcast %cst_48 : f32 to vector<8x1xf32>
    %165 = arith.divf %163, %164 : vector<8x1xf32>
    %166 = vector.broadcast %165 : vector<8x1xf32> to vector<8x32xf32>
    %167 = arith.subf %161, %166 : vector<8x32xf32>
    %168 = arith.mulf %167, %167 : vector<8x32xf32>
    %cst_49 = arith.constant dense<0.000000e+00> : vector<8xf32>
    %169 = vector.multi_reduction <add>, %168, %cst_49 [1] : vector<8x32xf32> to vector<8xf32>
    %170 = vector.shape_cast %169 : vector<8xf32> to vector<8x1xf32>
    %cst_50 = arith.constant 3.200000e+01 : f32
    %171 = vector.broadcast %cst_50 : f32 to vector<8x1xf32>
    %172 = arith.divf %170, %171 : vector<8x1xf32>
    %173 = vector.broadcast %165 : vector<8x1xf32> to vector<8x32xf32>
    %174 = arith.subf %161, %173 : vector<8x32xf32>
    %cst_51 = arith.constant 9.99999997E-7 : f32
    %175 = vector.broadcast %cst_51 : f32 to vector<8x1xf32>
    %176 = arith.addf %172, %175 : vector<8x1xf32>
    %177 = math.rsqrt %176 : vector<8x1xf32>
    %178 = vector.broadcast %177 : vector<8x1xf32> to vector<8x32xf32>
    %179 = arith.mulf %174, %178 : vector<8x32xf32>
    %180 = vector.broadcast %12 : vector<1x32xf32> to vector<8x32xf32>
    %181 = arith.mulf %179, %180 : vector<8x32xf32>
    %182 = vector.broadcast %13 : vector<1x32xf32> to vector<8x32xf32>
    %183 = arith.addf %181, %182 : vector<8x32xf32>
    %c0_52 = arith.constant 0 : index
    %c0_53 = arith.constant 0 : index
    %184 = vector.load %arg11[%c0_52, %c0_53] : memref<32x128xf32, #tpu.memory_space<vmem>>, vector<32x128xf32>
    %cst_54 = arith.constant dense<0.000000e+00> : vector<8x128xf32>
    %185 = tpu.matmul %183, %184, %cst_54 {dimension_numbers = #tpu.dot_dimension_numbers<[1], [0], [0], [1], [0, 0, 1, 1], [], []>} : vector<8x32xf32>, vector<32x128xf32>, vector<8x128xf32> -> vector<8x128xf32>
    %186 = vector.broadcast %7 : vector<1x128xf32> to vector<8x128xf32>
    %187 = arith.addf %185, %186 : vector<8x128xf32>
    %c0_55 = arith.constant 0 : index
    %c0_56 = arith.constant 0 : index
    %c0_57 = arith.constant 0 : index
    %188 = vector.load %arg12[%c0_55, %c0_56, %c0_57] : memref<1x8x128xf32, #tpu.memory_space<vmem>>, vector<1x8x128xf32>
    %189 = vector.shape_cast %188 : vector<1x8x128xf32> to vector<8x128xf32>
    %190 = vector.shape_cast %187 : vector<8x128xf32> to vector<1x8x128xf32>
    tpu.vector_store %arg12[%c0_55, %c0_56, %c0_57], %190 {strides = array<i32>} : memref<1x8x128xf32, #tpu.memory_space<vmem>>, vector<1x8x128xf32>,
    return
  }
  func.func @transform_0(%arg0: i32) -> (i32, i32, i32) {
    %c0_i32 = arith.constant 0 : i32
    %c0_i32_0 = arith.constant 0 : i32
    %c0_i32_1 = arith.constant 0 : i32
    return %arg0, %c0_i32, %c0_i32_0 : i32, i32, i32
  }
  func.func @transform_1(%arg0: i32) -> (i32, i32, i32) {
    %c0_i32 = arith.constant 0 : i32
    %c0_i32_0 = arith.constant 0 : i32
    %c0_i32_1 = arith.constant 0 : i32
    return %arg0, %c0_i32, %c0_i32_0 : i32, i32, i32
  }
  func.func @transform_2(%arg0: i32) -> (i32, i32, i32) {
    %c0_i32 = arith.constant 0 : i32
    %c0_i32_0 = arith.constant 0 : i32
    %c0_i32_1 = arith.constant 0 : i32
    return %arg0, %c0_i32, %c0_i32_0 : i32, i32, i32
  }
  func.func @transform_3(%arg0: i32) -> (i32, i32) {
    %c0_i32 = arith.constant 0 : i32
    %c0_i32_0 = arith.constant 0 : i32
    %c0_i32_1 = arith.constant 0 : i32
    return %c0_i32, %c0_i32_0 : i32, i32
  }
  func.func @transform_4(%arg0: i32) -> (i32, i32) {
    %c0_i32 = arith.constant 0 : i32
    %c0_i32_0 = arith.constant 0 : i32
    %c0_i32_1 = arith.constant 0 : i32
    return %c0_i32, %c0_i32_0 : i32, i32
  }
  func.func @transform_5(%arg0: i32) -> (i32, i32) {
    %c0_i32 = arith.constant 0 : i32
    %c0_i32_0 = arith.constant 0 : i32
    %c0_i32_1 = arith.constant 0 : i32
    return %c0_i32, %c0_i32_0 : i32, i32
  }
  func.func @transform_6(%arg0: i32) -> (i32, i32) {
    %c0_i32 = arith.constant 0 : i32
    %c0_i32_0 = arith.constant 0 : i32
    %c0_i32_1 = arith.constant 0 : i32
    return %c0_i32, %c0_i32_0 : i32, i32
  }
  func.func @transform_7(%arg0: i32) -> (i32, i32) {
    %c0_i32 = arith.constant 0 : i32
    %c0_i32_0 = arith.constant 0 : i32
    %c0_i32_1 = arith.constant 0 : i32
    return %c0_i32, %c0_i32_0 : i32, i32
  }
  func.func @transform_8(%arg0: i32) -> (i32, i32) {
    %c0_i32 = arith.constant 0 : i32
    %c0_i32_0 = arith.constant 0 : i32
    %c0_i32_1 = arith.constant 0 : i32
    return %c0_i32, %c0_i32_0 : i32, i32
  }
  func.func @transform_9(%arg0: i32) -> (i32, i32) {
    %c0_i32 = arith.constant 0 : i32
    %c0_i32_0 = arith.constant 0 : i32
    %c0_i32_1 = arith.constant 0 : i32
    return %c0_i32, %c0_i32_0 : i32, i32
  }
  func.func @transform_10(%arg0: i32) -> (i32, i32) {
    %c0_i32 = arith.constant 0 : i32
    %c0_i32_0 = arith.constant 0 : i32
    %c0_i32_1 = arith.constant 0 : i32
    return %c0_i32, %c0_i32_0 : i32, i32
  }
  func.func @transform_11(%arg0: i32) -> (i32, i32, i32) {
    %c0_i32 = arith.constant 0 : i32
    %c0_i32_0 = arith.constant 0 : i32
    %c0_i32_1 = arith.constant 0 : i32
    return %arg0, %c0_i32, %c0_i32_0 : i32, i32, i32
  }
}

</mosaic_0001>

<bundles_post_ra>
// kernel: tpu_custom_call.1
= control target key start
LH: loop header
LB: loop body
LE: loop exit
PB: predicated region body
PF: predicated region fallthrough
CT: control target
= control target key end

     0   :  { %16 = vsyncpa [#allocation3], 0  ;;  %s2587_s0 = inlined_call_operand.vmem [shape: s32[2,8,1], index: 0, kind: input, shape index: {}]   ;;  %s2588_s1 = inlined_call_operand.vmem [shape: f32[2,1,8], index: 1, kind: input, shape index: {}]   ;;  %s2589_s2 = inlined_call_operand.vmem [shape: f32[2,1,16], index: 2, kind: input, shape index: {}]   ;;  %s2590_s3 = inlined_call_operand.vmem [shape: f32[8,32], index: 3, kind: input, shape index: {}]   ;;  %s2591_s4 = inlined_call_operand.vmem [shape: f32[128,32], index: 4, kind: input, shape index: {}]   ;;  %s2592_s5 = inlined_call_operand.vmem [shape: f32[12,128], index: 5, kind: input, shape index: {}]   ;;  %s2593_s6 = inlined_call_operand.vmem [shape: f32[16,32], index: 6, kind: input, shape index: {}]   ;;  %s2594_s7 = inlined_call_operand.vmem [shape: f32[32,256], index: 7, kind: input, shape index: {}]   ;;  %s2595_s8 = inlined_call_operand.vmem [shape: f32[32,64], index: 8, kind: input, shape index: {}]   ;;  %s2596_s9 = inlined_call_operand.vmem [shape: f32[64,32], index: 9, kind: input, shape index: {}]   ;;  %s2597_s10 = inlined_call_operand.vmem [shape: f32[32,128], index: 10, kind: input, shape index: {}]   ;;  %s2598_s11 = inlined_call_operand.hbm [shape: f32[2,8,128], index: 11, kind: output, shape index: {}]  }
   0x1   :  { %18 = vsyncpa [#allocation3 + $0x1], 0  ;;  %s2193_s17 = smov 0   ;;  %s2195_s18 = smov 0  }
   0x2   :  { %s2197_s19 = smov 0   ;;  %s2199_s20 = smov 0  }
   0x3 LB: > { %2600 = sst [smem:[#allocation5_spill]] %s2115_s19  ;;  %s2214_s21 = sadd.s32 4294967295, %s2119_s20   ;;  %s2119_s20 = sphi %s2199_s20, %s2608_s20   ;;  %s2115_s19 = sphi %s2197_s19, %s2605_s19   ;;  %s2111_s18 = sphi %s2195_s18, %s2607_s18   ;;  %s2107_s17 = sphi %s2193_s17, %s2606_s17  }
   0x4   : > { %s1779_s22 = sadd.s32 4294967294, %s2119_s20   ;;  %s2218_s23 = sadd.s32 1, %s2119_s20  }
   0x5   : > { %s277_s24 = sadd.s32 1, %s2115_s19  ;;  %s274_s25 = ssub.s32 %s2119_s20, %s2218_s23 }
   0x6   : > { %p287_p0 = scmp.ne.s32.totalorder %s2115_s19, %s2111_s18  ;;  %p275_p1 = scmp.eq.s32.totalorder %s274_s25, 0 }
   0x7   : > { %p288_p2 = scmp.eq.s32.totalorder %s2214_s21, 1  ;;  %p293_p3 = scmp.ne.s32.totalorder %s2111_s18, %s2107_s17 }
   0x8   : > { %p294_p4 = scmp.eq.s32.totalorder %s1779_s22, 1  ;;  %p1782_p7 = scmp.ge.s32.totalorder %s2119_s20, 1 }
   0x9   : > { %s2229_s26 = scalar_select %p275_p1, %s2115_s19, %s277_s24  }
   0xa   : > { %p2231_p5 = por %p288_p2, %p287_p0  ;;  %p2235_p6 = por %p294_p4, %p293_p3 }
   0xb   : > { %2601 = sst [smem:[#allocation6_spill]] %s2229_s26  ;;  %p355_p8 = scmp.lt.s32.totalorder %s2119_s20, 3 }
   0xd   : > { %p356_p9 = pnand %p1782_p7, %p355_p8 }
   0xe   : > { %p400_p10 = scmp.lt.s32.totalorder (!%p356_p9), %s2214_s21, 1  ;;  %s2125_s29 = smov (!%p356_p9), 120  }
   0xf   : > { %359 = sbr.rel (%p356_p9) target bundleno = 3022 (0xbce), region = 64  ;;  %s2126_s30 = smov (!%p356_p9), 112  }
  0x10   : > { %s2127_s19 = smov (!%p356_p9), 104   ;;  %s2128_s26 = smov (!%p356_p9), 96  }
  0x11   : > { %s1805_s16 = sshll.u32 (!%p356_p9), %s2214_s21, 7  ;;  %s2132_s12 = smov (!%p356_p9), [#allocation2]  }
  0x14   : > { %v435_v0 = vld [vmem:[%s2591_s4 + $0x78] sm:$0xff]  ;;  %v2121_v1 = vmov 0   ;;  %v2122_v2 = vmov 0.0   ;;  %v434_v3 = vld [vmem:[%s2591_s4 + $0x70] sm:$0xff]  ;;  %s2250_s14 = scalar_select %p400_p10, %s2214_s21, 1  ;;  %v433_v4 = vld [vmem:[%s2591_s4 + $0x68] sm:$0xff]  ;;  %v413_v22 = vlaneseq }
  0x15   : > { %2036 = vset.pattern.permute.xlu0 %v2121_v1  ;;  %1870 = vmatprep.subr.mxu1 %v2122_v2  ;;  %v438_v5 = vld [vmem:[%s2593_s6 + $0x8] sm:$0xff]  ;;  %vm2123_vm0 = vmmov 0   ;;  %v437_v6 = vld [vmem:[%s2593_s6] sm:$0xff]  ;;  %vm439_vm1 = vcmask 130048   ;;  %v431_v10 = vld [vmem:[%s2591_s4 + $0x58] sm:$0xff]  ;;  %v2124_v25 = vmov 1.0  }
  0x16   : > { %1871 = vmatpush3.msra.mxu1 %v435_v0  ;;  %1863 = vmatprep.subr.mxu0 %v2122_v2  ;;  %s1784_s25 = sshll.u32 %s2250_s14, 3  ;;  %s409_s15 = scalar_lea.vmem %s2589_s2, %s2250_s14  ;;  %v432_v7 = vld [vmem:[%s2591_s4 + $0x60] sm:$0xff]  ;;  %v430_v11 = vld [vmem:[%s2591_s4 + $0x50] sm:$0xff]  ;;  %v429_v12 = vld [vmem:[%s2591_s4 + $0x48] sm:$0xff]  ;;  %v2331_v23 = vand.u32 127, %v413_v22  ;;  %v2336_v28 = vshrl.u32 %v413_v22, 7 }
  0x17   : > { %1872 = vmatprep.subr.mxu1 %v2122_v2  ;;  %1867 = vmatprep.mubr.msk.f32.mxu0 %vm2123_vm0, %v2122_v2  ;;  %s403_s22 = scalar_lea.vmem %s2587_s0, %s1784_s25  ;;  %v436_v8 = vld [vmem:[%s409_s15] sm:$0x1]  ;;  %v427_v14 = vld [vmem:[%s2591_s4 + $0x38] sm:$0xff]  ;;  %v426_v15 = vld [vmem:[%s2591_s4 + $0x30] sm:$0xff]  ;;  %vm595_vm4 = vcmask 261120   ;;  %vm728_vm5 = vcmask 64512   ;;  %s406_s13 = scalar_lea.vmem %s2588_s1, %s2250_s14 }
  0x18   : > { %1873 = vmatpush3.msra.mxu1 %v434_v3  ;;  %1864 = vmatpush3.msra.mxu0 %v438_v5  ;;  %v412_v9 = vld [vmem:[%s403_s22] sm:$0xff]  ;;  %v425_v16 = vld [vmem:[%s2591_s4 + $0x28] sm:$0xff]  ;;  %v423_v18 = vld [vmem:[%s2591_s4 + $0x18] sm:$0xff]  ;;  %v520_v31 = vsub.s32 0, %v2336_v28  ;;  %vm515_vm3 = vcmp.eq.s32.totalorder %v2336_v28, 0  ;;  %v612_v56 = vsub.s32 6, %v2336_v28  ;;  %vm724_vm6 = vcmp.ge.s32.totalorder %v2336_v28, %v2331_v23 }
  0x19   : > { %1874 = vmatprep.subr.mxu1 %v2122_v2  ;;  %1865 = vmatprep.subr.mxu0 %v2122_v2  ;;  %v428_v13 = vld [vmem:[%s2591_s4 + $0x40] sm:$0xff]  ;;  %v422_v19 = vld [vmem:[%s2591_s4 + $0x10] sm:$0xff]  ;;  %v421_v20 = vld [vmem:[%s2591_s4 + $0x8] sm:$0xff]  ;;  %v617_v57 = vsub.s32 7, %v2336_v28  ;;  %v704_v0 = vsub.s32 1, %v2336_v28  ;;  %s2130_s14 = smov 32  }
  0x1a   : > { %1875 = vmatpush3.msra.mxu1 %v433_v4  ;;  %1866 = vmatpush3.msra.mxu0 %v437_v6  ;;  %v424_v17 = vld [vmem:[%s2591_s4 + $0x20] sm:$0xff]  ;;  %v627_v45 = vld [vmem:[%s2594_s7 + $0x38] sm:$0xff]  ;;  %v626_v46 = vld [vmem:[%s2594_s7 + $0x30] sm:$0xff]  ;;  %s2131_s15 = smov 64   ;;  %vm1508_vm7 = vcmask 523264   ;;  %s2063_s21 = sshll.u32 %s2132_s12, 4  ;;  %s2064_s21 = int_to_ptr.vmem [resolvable:$false] %s2063_s21 }
  0x1b   : > { %416 = vperm.xlu0 %2036, %v412_v9   ;;  %1876 = vmatprep.subr.mxu1 %v2122_v2  ;;  %v420_v21 = vld [vmem:[%s2591_s4] sm:$0xff]  ;;  %v625_v47 = vld [vmem:[%s2594_s7 + $0x28] sm:$0xff]  ;;  %v623_v49 = vld [vmem:[%s2594_s7 + $0x18] sm:$0xff] }
  0x1c   : > { %1877 = vmatpush3.msra.mxu1 %v432_v7  ;;  %1868 = vmatmul.mubr.msk.f32.vlgmr.msra.gmra.mxu0 %vm439_vm1, %v436_v8  ;;  %v2341_v29 = vld [vmem:[%s2592_s5] sm:$0xff]  ;;  %v622_v50 = vld [vmem:[%s2594_s7 + $0x10] sm:$0xff]  ;;  %v621_v51 = vld [vmem:[%s2594_s7 + $0x8] sm:$0xff] }
  0x1d   : > { %1878 = vmatprep.subr.mxu1 %v2122_v2  ;;  %1902 = vmatprep.mubr.msk.f32.mxu1 %vm2123_vm0, %v2122_v2  ;;  %v593_v35 = vld [vmem:[%s2590_s3] sm:$0xff]  ;;  %v613_v58 = vrot.slane %v2341_v29, %v612_v56  ;;  %v618_v61 = vrot.slane %v2341_v29, %v617_v57  ;;  %v705_v1 = vrot.slane %v2341_v29, %v704_v0 }
  0x1e   : > { %1879 = vmatpush3.msra.mxu1 %v431_v10  ;;  %695 = vmatprep.mubr.f32.mxu0 %v2122_v2  ;;  %v624_v48 = vld [vmem:[%s2594_s7 + $0x20] sm:$0xff] }
  0x1f   : > { %1880 = vmatprep.subr.mxu1 %v2122_v2  ;;  %655 = vmatprep.subr.mxu0 %v627_v45  ;;  %v620_v52 = vld [vmem:[%s2594_s7] sm:$0xff] }
  0x20   : > { %1881 = vmatpush3.msra.mxu1 %v430_v11  ;;  %656 = vmatpush1.msra.mxu0 %v626_v46 }
  0x21   : > { %1882 = vmatprep.subr.mxu1 %v2122_v2  ;;  %657 = vmatprep.subr.mxu0 %v625_v47 }
  0x22   : > { %1883 = vmatpush3.msra.mxu1 %v429_v12  ;;  %658 = vmatpush1.msra.mxu0 %v624_v48 }
  0x23   : > { %1884 = vmatprep.subr.mxu1 %v2122_v2  ;;  %659 = vmatprep.subr.mxu0 %v623_v49 }
  0x24   : > { %1885 = vmatpush3.msra.mxu1 %v428_v13  ;;  %660 = vmatpush1.msra.mxu0 %v622_v50  ;;  %v2129_v13 = vmov -1e+09  }
  0x25   : > { %1886 = vmatprep.subr.mxu1 %v2122_v2  ;;  %661 = vmatprep.subr.mxu0 %v621_v51 }
  0x26   : > { %1887 = vmatpush3.msra.mxu1 %v427_v14  ;;  %662 = vmatpush1.msra.mxu0 %v620_v52  ;;  %v725_v14 = vsel %vm724_vm6, 0.0, %v2129_v13 }
  0x27   : > { %1888 = vmatprep.subr.mxu1 %v2122_v2  ;;  %1905 = vmatprep.subr.mxu0 %v2122_v2 }
  0x28   : > { %1889 = vmatpush3.msra.mxu1 %v426_v15 }
  0x29   : > { %1890 = vmatprep.subr.mxu1 %v2122_v2 }
  0x2a   : > { %1891 = vmatpush3.msra.mxu1 %v425_v16  ;;  %v1796_v16 = vld [vmem:[%s406_s13] ss:$0 sm:$0xff]  ;;  %s2065_s13 = scalar_lea.vmem %s2064_s21, 256 }
  0x2b   : > { %1892 = vmatprep.subr.mxu1 %v2122_v2 }
  0x2c   : > { %1893 = vmatpush3.msra.mxu1 %v424_v17 }
  0x2d   : > { %1894 = vmatprep.subr.mxu1 %v2122_v2 }
  0x2e   : > { %1895 = vmatpush3.msra.mxu1 %v423_v18 }
  0x2f   : > { %1896 = vmatprep.subr.mxu1 %v2122_v2 }
  0x30   : > { %1897 = vmatpush3.msra.mxu1 %v422_v19 }
  0x31   : > { %1898 = vmatprep.subr.mxu1 %v2122_v2 }
  0x32   : > { %1899 = vmatpush3.msra.mxu1 %v421_v20 }
  0x33   : > { %1900 = vmatprep.subr.mxu1 %v2122_v2 }
  0x34   : > { %1901 = vmatpush3.msra.mxu1 %v420_v21 }
  0x35   : > { %1935 = vmatprep.subr.mxu1 %v2122_v2 }
  0x96   : > { %v417_v24 = vpop.permute.xlu0 %416 }
  0x97   : > { %vm418_vm2 = vcmp.eq.s32.totalorder %v417_v24, %v2331_v23 }
  0x98   : > { %1903 = vmatmul.mubr.msk.f32.vlgmr.msra.gmra.mxu1 %vm418_vm2, %v2124_v25 }
  0x99   : > { %1937 = vmatprep.mubr.msk.f32.mxu1 %vm2123_vm0, %v2122_v2 }
  0xdc   : > { %v509_v26 = vpop.f32.mrf.mxu0 }
  0xdd   : > { %v510_v30 = vadd.f32 %v509_v26, %v2341_v29 }
  0xde   : > { %v1869_v27 = vpop.f32.mrf.mxu0 }
  0xdf   : > { %v521_v32 = vrot.slane %v510_v30, %v520_v31 }
  0xe1   : > { %v522_v33 = vsel %vm515_vm3, %v521_v32, 0.0 }
 0x158   : > { %v589_v34 = vpop.f32.mrf.mxu1 }
 0x159   : > { %v590_v36 = vadd.f32 %v589_v34, %v522_v33 }
 0x15a   : > { %v1904_v37 = vpop.f32.mrf.mxu1 }
 0x15b   : > { %v594_v38 = vadd.f32 %v593_v35, %v590_v36 }
 0x15d   : > { %v596_v39 = vsel %vm595_vm4, %v594_v38, 0.0 }
 0x15e   : > { %597 = vadd.xlane.f32.xlu0 %v596_v39 }
 0x1e7   : > { %v598_v40 = vpop.xlane.xlu0 %597 }
 0x1e8   : > { %v600_v41 = vmul.f32 0.03125, %v598_v40 }
 0x1ea   : > { %v601_v42 = vsub.f32 %v594_v38, %v600_v41 }
 0x1ec   : > { %v602_v43 = vmul.f32 %v601_v42, %v601_v42 }
 0x1ee   : > { %v603_v44 = vsel %vm595_vm4, %v602_v43, 0.0 }
 0x1ef   : > { %604 = vadd.xlane.f32.xlu1 %v603_v44 }
 0x278   : > { %v605_v53 = vpop.xlane.xlu1 %604 }
 0x279   : > { %v606_v54 = vmul.f32 0.03125, %v605_v53 }
 0x27b   : > { %v607_v55 = vadd.f32 1e-06, %v606_v54 }
 0x27d   : > { %2037 = vrsqrt.f32 %v607_v55 }
 0x28a   : > { %v2038_v59 = vpop.eup %2037 }
 0x28b   : > { %v609_v60 = vmul.f32 %v2038_v59, %v601_v42 }
 0x28d   : > { %v614_v62 = vmul.f32 %v613_v58, %v609_v60 }
 0x28f   : > { %v2382_v63 = vadd.f32 %v618_v61, %v614_v62 }
 0x291   : > { %1787 = vmatmul.mubr.msk.f32.vlgmr.msra.gmra.mxu0 %vm595_vm4, %v2382_v63 }
 0x292   : > { %1907 = vmatprep.mubr.msk.f32.mxu0 %vm2123_vm0, %v2122_v2 }
 0x351   : > { %v2392_v3 = vpop.f32.mrf.mxu0 }
 0x353   : > { %v699_v4 = vpop.f32.mrf.mxu0 }
 0x354   : > { %v706_v5 = vadd.f32 %v705_v1, %v699_v4 }
 0x356   : > { %708 = vrot.lane.b32.xlu1 %v706_v5, %s2125_s29 }
 0x35a   : > { %710 = vrot.lane.b32.xlu1 %v706_v5, %s2126_s30 }
 0x35e   : > { %712 = vrot.lane.b32.xlu1 %v706_v5, %s2127_s19  ;;  %s2552_s19 = scalar_lea.hbm %s2598_s11, %s1805_s16 }
 0x362   : > { %726 = vrot.lane.b32.xlu1 %v706_v5, %s2128_s26 }
 0x3c8   : > { %v709_v6 = vpop.permute.xlu1 %708 }
 0x3c9   : > { %803 = vrot.lane.b32.xlu1 %v709_v6, %s2128_s26 }
 0x3cc   : > { %v711_v7 = vpop.permute.xlu1 %710 }
 0x3cd   : > { %879 = vrot.lane.b32.xlu0 %v711_v7, %s2128_s26 }
 0x3d0   : > { %v713_v8 = vpop.permute.xlu1 %712 }
 0x3d1   : > { %955 = vrot.lane.b32.xlu1 %v713_v8, %s2128_s26 }
 0x3d4   : > { %v727_v9 = vpop.permute.xlu1 %726 }
 0x3d5   : > { %1906 = vmatpush3.xpose.msk.msra.mxu0 %vm728_vm5, %v727_v9 }
 0x3d6   : > { %1910 = vmatprep.subr.mxu0 %v2122_v2 }
 0x3d8   : > { %1908 = vmatmul.mubr.msk.f32.vlgmr.msra.gmra.mxu0 %vm728_vm5, %v706_v5 }
 0x3d9   : > { %1912 = vmatprep.mubr.msk.f32.mxu0 %vm2123_vm0, %v2122_v2 }
 0x43b   : > { %v804_v10 = vpop.permute.xlu1 %803 }
 0x43c   : > { %1911 = vmatpush3.xpose.msk.msra.mxu0 %vm728_vm5, %v804_v10 }
 0x43d   : > { %1915 = vmatprep.subr.mxu0 %v2122_v2 }
 0x43f   : > { %v880_v11 = vpop.permute.xlu0 %879  ;;  %1913 = vmatmul.mubr.msk.f32.vlgmr.msra.gmra.mxu0 %vm728_vm5, %v709_v6 }
 0x440   : > { %1916 = vmatpush3.xpose.msk.msra.mxu0 %vm728_vm5, %v880_v11  ;;  %1917 = vmatprep.mubr.msk.f32.mxu0 %vm2123_vm0, %v2122_v2 }
 0x441   : > { %1920 = vmatprep.subr.mxu0 %v2122_v2 }
 0x443   : > { %1918 = vmatmul.mubr.msk.f32.vlgmr.msra.gmra.mxu0 %vm728_vm5, %v711_v7  ;;  %v956_v12 = vpop.permute.xlu1 %955 }
 0x444   : > { %1921 = vmatpush3.xpose.msk.msra.mxu0 %vm728_vm5, %v956_v12  ;;  %1922 = vmatprep.mubr.msk.f32.mxu0 %vm2123_vm0, %v2122_v2 }
 0x445   : > { %1925 = vmatprep.subr.mxu0 %v2122_v2 }
 0x447   : > { %1923 = vmatmul.mubr.msk.f32.vlgmr.msra.gmra.mxu0 %vm728_vm5, %v713_v8 }
 0x448   : > { %1926 = vmatpush3.msra.mxu0 %v2392_v3  ;;  %1927 = vmatprep.mubr.msk.f32.mxu0 %vm2123_vm0, %v2122_v2 }
 0x449   : > { %1930 = vmatprep.subr.mxu0 %v2122_v2 }
 0x498   : > { %v799_v15 = vpop.f32.mrf.mxu0 }
 0x499   : > { %v800_v17 = vadd.f32 %v799_v15, %v725_v14 }
 0x49a   : > { %v1909_v18 = vpop.f32.mrf.mxu0 }
 0x49b   : > { %v1038_v19 = vadd.f32 %v1796_v16, %v800_v17 }
 0x49d   : > { %v1042_v20 = vsel %vm728_vm5, %v1038_v19, -inf }
 0x49e   : > { %1043 = vmax.xlane.f32.xlu1 %v1042_v20 }
 0x4ff   : > { %v875_v21 = vpop.f32.mrf.mxu0 }
 0x500   : > { %v876_v22 = vadd.f32 %v875_v21, %v725_v14 }
 0x501   : > { %v1914_v24 = vpop.f32.mrf.mxu0 }
 0x502   : > { %v1039_v25 = vadd.f32 %v1796_v16, %v876_v22 }
 0x503   : > { %v951_v26 = vpop.f32.mrf.mxu0 }
 0x504   : > { %v952_v23 = vadd.f32 %v951_v26, %v725_v14  ;;  %v1045_v27 = vsel %vm728_vm5, %v1039_v25, -inf }
 0x505   : > { %1046 = vmax.xlane.f32.xlu0 %v1045_v27  ;;  %v1919_v30 = vpop.f32.mrf.mxu0 }
 0x506   : > { %v1040_v32 = vadd.f32 %v1796_v16, %v952_v23 }
 0x507   : > { %v1027_v33 = vpop.f32.mrf.mxu0 }
 0x508   : > { %v1028_v34 = vadd.f32 %v1027_v33, %v725_v14  ;;  %v1048_v35 = vsel %vm728_vm5, %v1040_v32, -inf }
 0x509   : > { %1049 = vmax.xlane.f32.xlu1 %v1048_v35  ;;  %v1924_v36 = vpop.f32.mrf.mxu0 }
 0x50a   : > { %v1041_v37 = vadd.f32 %v1796_v16, %v1028_v34 }
 0x50c   : > { %v1051_v38 = vsel %vm728_vm5, %v1041_v37, -inf }
 0x50d   : > { %1052 = vmax.xlane.f32.xlu1 %v1051_v38 }
 0x51e   : > { %715 = vrot.lane.b32.xlu1 %v2392_v3, %s2128_s26 }
 0x527   : > { %v1044_v39 = vpop.xlane.xlu1 %1043 }
 0x528   : > { %v1054_v40 = vsub.f32 %v1038_v19, %v1044_v39  ;;  %v1387_v19 = vsub.s32 2, %v2336_v28 }
 0x52a   : > { %v1058_v41 = vmul.f32 1.442695, %v1054_v40  ;;  %v1388_v23 = vrot.slane %v2341_v29, %v1387_v19 }
 0x52c   : > { %2039 = vpow2.f32 %v1058_v41  ;;  %v1417_v41 = vld [vmem:[%s2595_s8 + $0x18] sm:$0xff] }
 0x539   : > { %v2040_v42 = vpop.eup %2039 }
 0x53a   : > { %v1066_v43 = vsel %vm728_vm5, %v2040_v42, 0.0 }
 0x542   : > { %1067 = vadd.xlane.f32.xlu1 %v1066_v43  ;;  %v1414_v43 = vld [vmem:[%s2595_s8] sm:$0xff] }
 0x58e   : > { %v1047_v44 = vpop.xlane.xlu0 %1046 }
 0x58f   : > { %v1055_v45 = vsub.f32 %v1039_v25, %v1047_v44  ;;  %v1503_v44 = vld [vmem:[%s2596_s9 + $0x38] sm:$0xff] }
 0x591   : > { %v1060_v46 = vmul.f32 1.442695, %v1055_v45  ;;  %v1502_v45 = vld [vmem:[%s2596_s9 + $0x30] sm:$0xff] }
 0x592   : > { %v1050_v47 = vpop.xlane.xlu1 %1049 }
 0x593   : > { %2041 = vpow2.f32 %v1060_v46  ;;  %v1056_v48 = vsub.f32 %v1040_v32, %v1050_v47  ;;  %v1501_v46 = vld [vmem:[%s2596_s9 + $0x28] sm:$0xff]  ;;  %v1500_v47 = vld [vmem:[%s2596_s9 + $0x20] sm:$0xff] }
 0x595   : > { %v1062_v49 = vmul.f32 1.442695, %v1056_v48  ;;  %v1499_v48 = vld [vmem:[%s2596_s9 + $0x18] sm:$0xff] }
 0x596   : > { %v1053_v50 = vpop.xlane.xlu1 %1052 }
 0x597   : > { %2043 = vpow2.f32 %v1062_v49  ;;  %v1057_v51 = vsub.f32 %v1041_v37, %v1053_v50 }
 0x599   : > { %v1064_v52 = vmul.f32 1.442695, %v1057_v51 }
 0x59a   : > { %v716_v59 = vpop.permute.xlu1 %715 }
 0x59b   : > { %2045 = vpow2.f32 %v1064_v52  ;;  %v411_v52 = vld [vmem:[%s2592_s5 + $0x8] sm:$0xf] }
 0x5a0   : > { %v2042_v53 = vpop.eup %2041 }
 0x5a1   : > { %v1069_v54 = vsel %vm728_vm5, %v2042_v53, 0.0 }
 0x5a2   : > { %1070 = vadd.xlane.f32.xlu0 %v1069_v54 }
 0x5a4   : > { %v2044_v55 = vpop.eup %2043 }
 0x5a5   : > { %v1072_v56 = vsel %vm728_vm5, %v2044_v55, 0.0 }
 0x5a6   : > { %1073 = vadd.xlane.f32.xlu1 %v1072_v56 }
 0x5a8   : > { %v2046_v57 = vpop.eup %2045 }
 0x5a9   : > { %v1075_v58 = vsel %vm728_vm5, %v2046_v57, 0.0 }
 0x5aa   : > { %1076 = vadd.xlane.f32.xlu0 %v1075_v58 }
 0x5b7   : > { %721 = vrot.lane.b32.xlu1 %v2392_v3, %s2130_s14  ;;  %s397_s14 = sand.u32 1, %s2111_s18  }
 0x5b8   : > { %s1689_s26 = scalar_lea.sflag [#allocation3], %s397_s14 }
 0x5c0   : > { %718 = vrot.lane.b32.xlu0 %v2392_v3, %s2131_s15  ;;  %s1783_s15 = sshll.u32 %s397_s14, 3 }
 0x5c1   : > { %s399_s22 = scalar_lea.vmem [#allocation2], %s1783_s15 }
 0x5c2   : > { %s1702_s24 = sshll.u32 %s399_s22, 4  ;;  %s1703_s24 = int_to_ptr.vmem [resolvable:$true] %s1702_s24 }
 0x5c3   : > { %s2059_s25 = scalar_lea.vmem %s1703_s24, 128  ;;  %p2066_p0 = scmp.lt.s32.totalorder %s1703_s24, %s2064_s21 }
 0x5c4   : > { %p2060_p11 = scmp.ne.s32.totalorder %s1703_s24, %s2059_s25  ;;  %p2067_p1 = scmp.lt.s32.totalorder %s2065_s13, %s2059_s25 }
 0x5c6   : > { %p2061_p12 = pnand %p2060_p11, %p2231_p5  ;;  %p2068_p2 = por %p2067_p1, %p2066_p0 }
 0x5c8   : > { %p2062_p13 = pneg %p2061_p12 }
 0x5ca   : > { %p2069_p3 = pnand %p2068_p2, %p2062_p13 }
 0x5cb   : > { %v1068_v60 = vpop.xlane.xlu1 %1067 }
 0x5cc   : > { %2047 = vrcp.f32 %v1068_v60  ;;  %v1420_v60 = vsub.s32 3, %v2336_v28 }
 0x5d9   : > { %v2048_v61 = vpop.eup %2047 }
 0x5da   : > { %v1082_v62 = vmul.f32 %v2048_v61, %v2040_v42  ;;  %v1416_v42 = vld [vmem:[%s2595_s8 + $0x10] sm:$0xff]  ;;  %v1421_v61 = vrot.slane %v2341_v29, %v1420_v60 }
 0x5dc   : > { %1928 = vmatmul.mubr.msk.f32.vlgmr.msra.gmra.mxu0 %vm728_vm5, %v1082_v62 }
 0x5dd   : > { %1931 = vmatpush3.msra.mxu0 %v716_v59  ;;  %1932 = vmatprep.mubr.msk.f32.mxu0 %vm2123_vm0, %v2122_v2  ;;  %v1498_v59 = vld [vmem:[%s2596_s9 + $0x10] sm:$0xff] }
 0x5de   : > { %1940 = vmatprep.subr.mxu0 %v2122_v2 }
 0x62b   : > { %v1071_v1 = vpop.xlane.xlu0 %1070 }
 0x62c   : > { %2049 = vrcp.f32 %v1071_v1 }
 0x62f   : > { %v1074_v4 = vpop.xlane.xlu1 %1073 }
 0x630   : > { %2051 = vrcp.f32 %v1074_v4 }
 0x633   : > { %v1077_v5 = vpop.xlane.xlu0 %1076  ;;  %v722_v8 = vpop.permute.xlu1 %721 }
 0x634   : > { %2053 = vrcp.f32 %v1077_v5 }
 0x637   : > { %v719_v3 = vpop.permute.xlu0 %718 }
 0x638   : > { %1936 = vmatpush3.msra.mxu1 %v719_v3  ;;  %v1506_v3 = vsub.s32 4, %v2336_v28 }
 0x639   : > { %v2050_v6 = vpop.eup %2049  ;;  %1945 = vmatprep.subr.mxu1 %v2122_v2 }
 0x63a   : > { %v1083_v7 = vmul.f32 %v2050_v6, %v2042_v53  ;;  %v1407_v53 = vrot.slane %v411_v52, %v520_v31  ;;  %v1497_v31 = vld [vmem:[%s2596_s9 + $0x8] sm:$0xff]  ;;  %v1507_v6 = vrot.slane %v2341_v29, %v1506_v3 }
 0x63c   : > { %1933 = vmatmul.mubr.msk.f32.vlgmr.msra.gmra.mxu0 %vm728_vm5, %v1083_v7 }
 0x63d   : > { %v2052_v9 = vpop.eup %2051  ;;  %1941 = vmatpush3.msra.mxu0 %v722_v8  ;;  %1942 = vmatprep.mubr.msk.f32.mxu0 %vm2123_vm0, %v2122_v2 }
 0x63e   : > { %v1084_v10 = vmul.f32 %v2052_v9, %v2044_v55  ;;  %1956 = vmatprep.subr.mxu0 %v2122_v2  ;;  %v1412_v55 = vrot.slane %v411_v52, %v704_v0  ;;  %v1496_v0 = vld [vmem:[%s2596_s9] sm:$0xff] }
 0x640   : > { %1938 = vmatmul.mubr.msk.f32.vlgmr.msra.gmra.mxu1 %vm728_vm5, %v1084_v10 }
 0x641   : > { %v2054_v11 = vpop.eup %2053  ;;  %1953 = vmatprep.mubr.msk.f32.mxu1 %vm2123_vm0, %v2122_v2  ;;  %1946 = vmatpush3.msra.mxu1 %v1417_v41 }
 0x642   : > { %v1085_v12 = vmul.f32 %v2054_v11, %v2046_v57  ;;  %1947 = vmatprep.subr.mxu1 %v2122_v2 }
 0x643   : > { %1948 = vmatpush3.msra.mxu1 %v1416_v42 }
 0x644   : > { %1943 = vmatmul.mubr.msk.f32.vlgmr.msra.gmra.mxu0 %vm728_vm5, %v1085_v12  ;;  %1949 = vmatprep.subr.mxu1 %v2122_v2 }
 0x645   : > { %1972 = vmatprep.mubr.msk.f32.mxu0 %vm2123_vm0, %v2122_v2  ;;  %1957 = vmatpush3.msra.mxu0 %v1503_v44 }
 0x646   : > { %1958 = vmatprep.subr.mxu0 %v2122_v2 }
 0x647   : > { %1959 = vmatpush3.msra.mxu0 %v1502_v45 }
 0x648   : > { %1960 = vmatprep.subr.mxu0 %v2122_v2 }
 0x649   : > { %1961 = vmatpush3.msra.mxu0 %v1501_v46 }
 0x64a   : > { %1962 = vmatprep.subr.mxu0 %v2122_v2 }
 0x64b   : > { %1963 = vmatpush3.msra.mxu0 %v1500_v47 }
 0x64c   : > { %1964 = vmatprep.subr.mxu0 %v2122_v2 }
 0x64d   : > { %1965 = vmatpush3.msra.mxu0 %v1499_v48 }
 0x64e   : > { %1966 = vmatprep.subr.mxu0 %v2122_v2 }
 0x64f   : > { %1967 = vmatpush3.msra.mxu0 %v1498_v59 }
 0x650   : > { %1968 = vmatprep.subr.mxu0 %v2122_v2 }
 0x651   : > { %1969 = vmatpush3.msra.mxu0 %v1497_v31 }
 0x652   : > { %1970 = vmatprep.subr.mxu0 %v2122_v2 }
 0x653   : > { %1971 = vmatpush3.msra.mxu0 %v1496_v0 }
 0x69c   : > { %v1155_v13 = vpop.f32.mrf.mxu0 }
 0x69d   : > { %v1378_v20 = vsel %vm595_vm4, %v1155_v13, 0.0 }
 0x69e   : > { %v1929_v14 = vpop.f32.mrf.mxu0 }
 0x6fc   : > { %v1228_v15 = vpop.f32.mrf.mxu0 }
 0x6fd   : > { %v1379_v17 = vsel %vm595_vm4, %v1228_v15, 0.0 }
 0x6fe   : > { %v1934_v16 = vpop.f32.mrf.mxu0  ;;  %v1380_v22 = vadd.f32 %v1379_v17, %v1378_v20  ;;  %v1609_v17 = vld [vmem:[%s2597_s10 + $0x18] sm:$0xff]  ;;  %v1607_v20 = vld [vmem:[%s2597_s10 + $0x8] sm:$0xff] }
 0x700   : > { %v1301_v18 = vpop.f32.mrf.mxu1 }
 0x701   : > { %v1381_v21 = vsel %vm595_vm4, %v1301_v18, 0.0  ;;  %v1608_v18 = vld [vmem:[%s2597_s10 + $0x10] sm:$0xff] }
 0x702   : > { %v1939_v24 = vpop.f32.mrf.mxu1  ;;  %v1382_v25 = vadd.f32 %v1381_v21, %v1380_v22  ;;  %v1606_v21 = vld [vmem:[%s2597_s10] sm:$0xff] }
 0x704   : > { %v1374_v26 = vpop.f32.mrf.mxu0 }
 0x705   : > { %v1383_v27 = vsel %vm595_vm4, %v1374_v26, 0.0  ;;  %v1599_v26 = vrot.slane %v411_v52, %v1387_v19 }
 0x706   : > { %v1384_v30 = vadd.f32 %v1383_v27, %v1382_v25  ;;  %v1944_v32 = vpop.f32.mrf.mxu0  ;;  %v1604_v27 = vrot.slane %v411_v52, %v1420_v60 }
 0x708   : > { %v1389_v33 = vadd.f32 %v1388_v23, %v1384_v30 }
 0x70a   : > { %v1390_v34 = vadd.f32 %v1389_v33, %v2382_v63  ;;  %v1415_v63 = vld [vmem:[%s2595_s8 + $0x8] sm:$0xff] }
 0x70b   : > { %1950 = vmatpush3.msra.mxu1 %v1415_v63 }
 0x70c   : > { %v1391_v35 = vsel %vm595_vm4, %v1390_v34, 0.0  ;;  %1951 = vmatprep.subr.mxu1 %v2122_v2 }
 0x70d   : > { %1392 = vadd.xlane.f32.xlu1 %v1391_v35  ;;  %1952 = vmatpush3.msra.mxu1 %v1414_v43 }
 0x70e   : > { %1975 = vmatprep.subr.mxu1 %v2122_v2 }
 0x796   : > { %v1393_v36 = vpop.xlane.xlu1 %1392 }
 0x797   : > { %v1394_v37 = vmul.f32 0.03125, %v1393_v36 }
 0x799   : > { %v1395_v38 = vsub.f32 %v1390_v34, %v1394_v37 }
 0x79b   : > { %v1396_v39 = vmul.f32 %v1395_v38, %v1395_v38 }
 0x79d   : > { %v1397_v40 = vsel %vm595_vm4, %v1396_v39, 0.0 }
 0x79e   : > { %1398 = vadd.xlane.f32.xlu0 %v1397_v40 }
 0x827   : > { %v1399_v49 = vpop.xlane.xlu0 %1398 }
 0x828   : > { %v1400_v50 = vmul.f32 0.03125, %v1399_v49 }
 0x82a   : > { %v1401_v51 = vadd.f32 1e-06, %v1400_v50 }
 0x82c   : > { %2055 = vrsqrt.f32 %v1401_v51 }
 0x839   : > { %v2056_v54 = vpop.eup %2055 }
 0x83a   : > { %v1403_v56 = vmul.f32 %v2056_v54, %v1395_v38 }
 0x83c   : > { %v1408_v57 = vmul.f32 %v1407_v53, %v1403_v56 }
 0x83e   : > { %v1413_v58 = vadd.f32 %v1412_v55, %v1408_v57 }
 0x840   : > { %1954 = vmatmul.mubr.msk.f32.vlgmr.msra.gmra.mxu1 %vm595_vm4, %v1413_v58 }
 0x841   : > { %1983 = vmatprep.mubr.msk.f32.mxu1 %vm2123_vm0, %v2122_v2  ;;  %1976 = vmatpush3.msra.mxu1 %v1609_v17 }
 0x842   : > { %1977 = vmatprep.subr.mxu1 %v2122_v2 }
 0x843   : > { %1978 = vmatpush3.msra.mxu1 %v1608_v18 }
 0x844   : > { %1979 = vmatprep.subr.mxu1 %v2122_v2 }
 0x845   : > { %1980 = vmatpush3.msra.mxu1 %v1607_v20 }
 0x846   : > { %1981 = vmatprep.subr.mxu1 %v2122_v2  ;;  %v1612_v2 = vsub.s32 5, %v2336_v28 }
 0x847   : > { %1982 = vmatpush3.msra.mxu1 %v1606_v21 }
 0x848   : > { %v1613_v34 = vrot.slane %v2341_v29, %v1612_v2 }
 0x900   : > { %v1491_v62 = vpop.f32.mrf.mxu1 }
 0x901   : > { %v1492_v1 = vadd.f32 %v1491_v62, %v1421_v61 }
 0x902   : > { %v1955_v4 = vpop.f32.mrf.mxu1 }
 0x903   : > { %v1495_v5 = vmax.f32 %v1492_v1, 0.0 }
 0x905   : > { %1973 = vmatmul.mubr.msk.f32.vlgmr.msra.gmra.mxu0 %vm1508_vm7, %v1495_v5 }
 0x9c5   : > { %v1578_v7 = vpop.f32.mrf.mxu0 }
 0x9c6   : > { %v1579_v8 = vadd.f32 %v1578_v7, %v1507_v6 }
 0x9c7   : > { %v1974_v9 = vpop.f32.mrf.mxu0 }
 0x9c8   : > { %v1582_v10 = vadd.f32 %v1579_v8, %v1413_v58 }
 0x9ca   : > { %v1583_v11 = vsel %vm595_vm4, %v1582_v10, 0.0 }
 0x9cb   : > { %1584 = vadd.xlane.f32.xlu0 %v1583_v11 }
 0xa54   : > { %v1585_v12 = vpop.xlane.xlu0 %1584 }
 0xa55   : > { %v1586_v13 = vmul.f32 0.03125, %v1585_v12 }
 0xa57   : > { %v1587_v14 = vsub.f32 %v1582_v10, %v1586_v13 }
 0xa59   : > { %v1588_v15 = vmul.f32 %v1587_v14, %v1587_v14 }
 0xa5b   : > { %v1589_v16 = vsel %vm595_vm4, %v1588_v15, 0.0 }
 0xa5c   : > { %1590 = vadd.xlane.f32.xlu1 %v1589_v16 }
 0xae5   : > { %v1591_v22 = vpop.xlane.xlu1 %1590 }
 0xae6   : > { %v1592_v24 = vmul.f32 0.03125, %v1591_v22 }
 0xae8   : > { %v1593_v25 = vadd.f32 1e-06, %v1592_v24 }
 0xaea   : > { %2057 = vrsqrt.f32 %v1593_v25 }
 0xaf7   : > { %v2058_v23 = vpop.eup %2057 }
 0xaf8   : > { %v1595_v30 = vmul.f32 %v2058_v23, %v1587_v14 }
 0xafa   : > { %v1600_v32 = vmul.f32 %v1599_v26, %v1595_v30 }
 0xafc   : > { %v1605_v33 = vadd.f32 %v1604_v27, %v1600_v32 }
 0xafe   : > { %1984 = vmatmul.mubr.msk.f32.vlgmr.msra.gmra.mxu1 %vm595_vm4, %v1605_v33 }
 0xbbe   : > { %v1683_v35 = vpop.f32.mrf.mxu1 }
 0xbbf   : > { %v1684_v36 = vadd.f32 %v1683_v35, %v1613_v34 }
 0xbc0   : > { %v1985_v19 = vpop.f32.mrf.mxu1 }
 0xbc1   : > { %1687 = vst [vmem:[%s399_s22] sm:$0xff] %v1684_v36 }
 0xbc2   : > { %2072 = shalt.err (!%p2069_p3)
}
 0xbc3   : > { %s2073_s15 = scalar_lea.hbm %s2552_s19, 128  ;;  %s2077_s22 = scalar_lea.hbm %s2598_s11, 256 }
 0xbc4   : > { %p2074_p4 = scmp.ne.s32.totalorder %s2552_s19, %s2073_s15  ;;  %p2078_p9 = scmp.lt.s32.totalorder %s2552_s19, %s2598_s11 }
 0xbc5   : > { %p2079_p10 = scmp.lt.s32.totalorder %s2077_s22, %s2073_s15 }
 0xbc6   : > { %p2075_p7 = pnand %p2074_p4, %p2231_p5 }
 0xbc7   : > { %p2080_p11 = por %p2079_p10, %p2078_p9 }
 0xbc8   : > { %p2076_p8 = pneg %p2075_p7 }
 0xbca   : > { %p2081_p12 = pnand %p2080_p11, %p2076_p8 }
 0xbcc   : > { %2084 = shalt.err (!%p2081_p12)
}
 0xbcd   : > { %1986 = dma.vmem_to_hbm [thread:$0]  (%p2231_p5), %s1703_s24, 128, %s2552_s19, %s1689_s26  }
 0xbce PF: > { %p1992_p13 = scmp.ge.s32.totalorder %s2119_s20, 2  ;;  %s1714_s25 = sand.u32 1, %s2107_s17  }
 0xbcf   : > { %s1715_s12 = scalar_lea.sflag [#allocation3], %s1714_s25 }
 0xbd0   : > { %p1989_p0 = pnand %p1992_p13, %p2235_p6 }
 0xbd2   : > { %p1990_p1 = pneg %p1989_p0 }
 0xbd4   : > { %2102 = dma.done.wait (%p1990_p1), %s1715_s12, 128  }
 0xbd5   : > { %2104 = vsyncadd (%p1990_p1), %s1715_s12, 4294967168  ;;  %s2604_s21 = sld [smem:[#allocation5_spill]]  ;;  %p21_p2 = scmp.ge.s32.totalorder %s2218_s23, 4  }
 0xbd6   : > { %s2605_s19 = sld [smem:[#allocation6_spill]]  ;;  %s2606_s17 = smov %s2111_s18 }
 0xbd7   : > { %s2608_s20 = smov %s2218_s23  ;;  %23 = sbr.rel (!%p21_p2) target bundleno = 3 (0x3), region = 105 }
 0xbdb   : > { %s2607_s18 = smov %s2604_s21 }
 0xbdc   :  { %1720 = vsyncpa [#allocation3], 1 }
 0xbdd   :  { %1722 = vsyncpa [#allocation3 + $0x1], 1 }

</bundles_post_ra>
